<compile_context>
chip_gen: v5e
topology: v5e:2x2
jax: 0.10.0
libtpu: 0.0.40
codegen_flags: <defaults>
</compile_context>

<pallas_src>
import jax
import jax.numpy as jnp
from jax.experimental import pallas as pl
from jax.experimental.pallas import tpu as pltpu


def _round_up(n, m):
    return ((n + m - 1) // m) * m


def _vmem_capacity_bytes():
    """Physical VMEM per TensorCore; conservative (v7x-sized) fallback."""
    try:
        cap = int(pltpu.get_tpu_info().vmem_capacity_bytes)
        if cap >= 16 * 1024 * 1024:
            return cap
    except Exception:
        pass
    return 64 * 1024 * 1024


def _choose_block_batch(B, step_bytes, budget, prefer_multi_step):
    """Largest divisor bt of B whose per-step VMEM footprint fits `budget`.

    On megacore parts (prefer_multi_step=True, e.g. v7x) prefer an even step
    count >= 2 so the "parallel" grid axis shards across both TensorCores; on
    single-core parts (v5e/v6e) just take the biggest block that fits (fewer
    steps -> less per-step overhead, better HBM roofline tracking).
    """
    divisors = [d for d in range(1, B + 1) if B % d == 0]
    fits = [d for d in divisors if step_bytes(d) <= budget] or [1]
    if prefer_multi_step:
        even = [d for d in fits if (B // d) >= 2 and (B // d) % 2 == 0]
        if even:
            return max(even)
        multi = [d for d in fits if (B // d) >= 2]
        if multi:
            return max(multi)
    return max(fits)


def _make_kernel(layers, D, head_dim, d_out_pad, mxu_dtype):
    """Per-grid-step kernel over a (bt, N, ...) block of the batch."""
    n_wlg = layers * (layers - 1) // 2

    def kernel(adj_ref, x_ref, inv_ref, *refs):
        idx = 0
        wl_x = refs[idx:idx + layers]; idx += layers          # (D, hd) per layer
        wl_g = refs[idx:idx + n_wlg]; idx += n_wlg            # (hd, hd) per (l, j<l)
        b2 = refs[idx:idx + layers]; idx += layers            # (1, hd) f32, pre-doubled
        wout_x = refs[idx]; idx += 1                          # (D, d_out_pad)
        wout_g = refs[idx:idx + layers]; idx += layers        # (hd, d_out_pad) per layer
        bout = refs[idx]; idx += 1                            # (1, d_out_pad) f32
        o_ref = refs[idx]                                     # (bt, N, d_out_pad)

        adj = adj_ref[...]                                    # (bt, n, n) mxu_dtype
        x = x_ref[...]                                        # (bt, n, D) mxu_dtype
        bt, n, _ = adj.shape

        # Exact f32 degree reciprocal precomputed on host; broadcast hoisted
        # out of the layer loop (single lane-broadcast, reused every layer).
        inv = inv_ref[...].reshape(bt * n, 1)
        inv_bd = jnp.broadcast_to(inv, (bt * n, head_dim))

        # Incremental Ax: adj multiplies each concat segment exactly once.
        ax_x = jnp.einsum('bij,bjk->bik', adj, x,
                          preferred_element_type=jnp.float32)
        s_x = (ax_x + x.astype(jnp.float32)).reshape(bt * n, D).astype(mxu_dtype)

        s_g = []      # (Ax + outputs) segments for previously produced g_j
        g_m = []      # g_l in mxu_dtype (feeds adj@g_l and the output matmul)
        wlg_off = 0
        for l in range(layers):
            # proj_l = (Ax_l + outputs_l) @ W_l + 2*b_l, decomposed over the
            # concat segments (same MACs as the fused concat matmul, no
            # lane-padded cache and no lane concatenation needed).
            proj = (jnp.dot(s_x, wl_x[l][...],
                            preferred_element_type=jnp.float32) + b2[l][...])
            for j in range(l):
                proj = proj + jnp.dot(s_g[j], wl_g[wlg_off + j][...],
                                      preferred_element_type=jnp.float32)
            wlg_off += l

            g = jnp.maximum(proj * inv_bd, 0.0)               # relu(AxW/denom), f32
            gm = g.astype(mxu_dtype)
            g_m.append(gm)
            if l + 1 < layers:                                # g_{L-1} feeds no later layer
                ax_g = jnp.einsum('bij,bjk->bik', adj,
                                  gm.reshape(bt, n, head_dim),
                                  preferred_element_type=jnp.float32)
                s_g.append((ax_g.reshape(bt * n, head_dim) + g).astype(mxu_dtype))

        # out = (concat(g_0..g_{L-1}) + x) @ W_out + b_out, decomposed the
        # same way; W_out columns are zero-padded to d_out_pad so the output
        # block is lane-dense.   gcn_drop == identity (eval mode).
        out = (jnp.dot(x.reshape(bt * n, D), wout_x[...],
                       preferred_element_type=jnp.float32) + bout[...])
        for l in range(layers):
            out = out + jnp.dot(g_m[l], wout_g[l][...],
                                preferred_element_type=jnp.float32)
        o_ref[...] = out.reshape(bt, n, d_out_pad).astype(o_ref.dtype)

    return kernel


def _prepare_params(weights, biases, w_out, b_out, D, head_dim, layers,
                    d_out_pad, mxu_dtype):
    """Pre-split the per-layer weights by concat segment, pre-double biases,
    and zero-pad the output projection columns to a lane-dense width."""
    f32 = jnp.float32
    wl_x, wl_g, b2 = [], [], []
    for l, (W, b) in enumerate(zip(weights, biases)):
        W = jnp.asarray(W, f32)
        wl_x.append(W[:D].astype(mxu_dtype))                            # x rows
        for j in range(l):
            wl_g.append(W[D + j * head_dim:D + (j + 1) * head_dim]
                        .astype(mxu_dtype))                             # g_j rows
        b2.append(jnp.asarray(b, f32).reshape(1, head_dim) * 2.0)       # 2*b_l

    w_out = jnp.asarray(w_out, f32)
    wout_x = (jnp.zeros((D, d_out_pad), f32).at[:, :D].set(w_out)
              .astype(mxu_dtype))
    wout_g = [jnp.zeros((head_dim, d_out_pad), f32)
              .at[:, :D].set(w_out[l * head_dim:(l + 1) * head_dim, :])
              .astype(mxu_dtype)
              for l in range(layers)]
    bout = jnp.zeros((1, d_out_pad), f32).at[:, :D].set(jnp.asarray(b_out, f32))
    return wl_x, wl_g, b2, wout_x, wout_g, bout


def graph_conv_layer(adj, gcn_inputs, weights, biases, w_out, b_out,
                     mxu_dtype=jnp.bfloat16):
    """adj: (B,N,N); gcn_inputs: (B,N,D).

    weights[l]: (D + head_dim*l, head_dim), biases[l]: (1, head_dim)
    w_out: (D, D), b_out: (1, D)   -- pre-transposed, i.e. y = x @ W + b.

    mxu_dtype defaults to bf16 (native MXU operand dtype on v5e/v6e/v7x) with
    f32 accumulation; the degree denominator is always computed exactly in
    f32 from the original adj.  Pass mxu_dtype=jnp.float32 for an exact path
    (e.g. weighted / attention-derived adjacencies needing tight tolerances).
    """
    B, N, D = gcn_inputs.shape
    layers = len(weights)
    head_dim = weights[0].shape[1]
    assert head_dim * layers == D, "mem_dim must be divisible by layers"

    f32 = jnp.float32
    n_pad = _round_up(N, 8)        # sublane-aligned -> (bt,N,K)<->(bt*N,K) reshapes are free
    d_out_pad = _round_up(D, 128)  # lane-dense output block

    # Host-side prep: exact f32 degree reciprocal, mxu-dtype adj/x streams.
    adj32 = jnp.asarray(adj, f32)
    inv_denom = 1.0 / (jnp.sum(adj32, axis=-1, keepdims=True) + 1.0)   # (B,N,1) f32
    pad_rows = ((0, 0), (0, n_pad - N), (0, 0))
    adj_p = jnp.pad(adj32, ((0, 0), (0, n_pad - N), (0, n_pad - N))).astype(mxu_dtype)
    x_p = jnp.pad(jnp.asarray(gcn_inputs, f32), pad_rows).astype(mxu_dtype)
    inv_p = jnp.pad(inv_denom, pad_rows, constant_values=1.0)

    wl_x, wl_g, b2, wout_x, wout_g, bout = _prepare_params(
        weights, biases, w_out, b_out, D, head_dim, layers, d_out_pad, mxu_dtype)
    const_inputs = list(wl_x) + list(wl_g) + list(b2) + [wout_x] + list(wout_g) + [bout]
    weight_bytes = sum(int(a.size) * a.dtype.itemsize for a in const_inputs)
    mxu_bytes = jnp.dtype(mxu_dtype).itemsize

    # Byte-aware per-step VMEM footprint (double-buffered blocks + weights +
    # a generous bound on in-kernel temporaries).
    def step_bytes(bt):
        io_blk = bt * n_pad * (n_pad + D + 1) * mxu_bytes + bt * n_pad * 4
        out_blk = bt * n_pad * d_out_pad * 4
        tmp = bt * n_pad * (3 * D + 6 * layers * head_dim + 3 * d_out_pad) * 4
        return 2 * (io_blk + out_blk) + 2 * weight_bytes + tmp

    vmem_cap = _vmem_capacity_bytes()
    budget = int(vmem_cap * 0.70)
    # 64 MiB/TC parts (v7x-class) are megacore: keep an even, >=2 step count
    # so the "parallel" axis shards across both TensorCores.  Larger-VMEM
    # single-core parts (v5e/v6e, 128 MiB) just take the biggest block.
    prefer_multi = vmem_cap <= 64 * 1024 * 1024
    bt = _choose_block_batch(B, step_bytes, budget, prefer_multi)
    grid = (B // bt,)
    vmem_limit = int(min(vmem_cap * 0.85,
                         max(2 * step_bytes(bt), 32 * 1024 * 1024)))

    # Advisory cost estimate for XLA's scheduler.
    flops = 2 * n_pad * n_pad * (D + (layers - 1) * head_dim)          # incremental adj matmuls
    flops += sum(2 * n_pad * (D + l * head_dim) * head_dim for l in range(layers))
    flops += 2 * n_pad * (D + layers * head_dim) * d_out_pad           # residual + output proj
    flops *= B
    bytes_accessed = ((int(adj_p.size) + int(x_p.size)) * mxu_bytes
                      + int(inv_p.size) * 4 + weight_bytes
                      + B * n_pad * d_out_pad * 4)
    cost = pl.CostEstimate(flops=int(flops), transcendentals=0,
                           bytes_accessed=int(bytes_accessed))

    def const_spec(a):
        # Grid-invariant operand: constant index_map, fetched once by the
        # pipeline.  (Weight footprint is negligible next to the adj block,
        # so single-buffering them buys essentially nothing here.)
        return pl.BlockSpec(a.shape, lambda b: (0,) * a.ndim)

    in_specs = [
        pl.BlockSpec((bt, n_pad, n_pad), lambda b: (b, 0, 0)),   # adj
        pl.BlockSpec((bt, n_pad, D), lambda b: (b, 0, 0)),       # x
        pl.BlockSpec((bt, n_pad, 1), lambda b: (b, 0, 0)),       # 1/denom (f32, exact)
    ] + [const_spec(a) for a in const_inputs]
    out_spec = pl.BlockSpec((bt, n_pad, d_out_pad), lambda b: (b, 0, 0))

    kernel = _make_kernel(layers, D, head_dim, d_out_pad, mxu_dtype)
    out_padded = pl.pallas_call(
        kernel,
        out_shape=jax.ShapeDtypeStruct((B, n_pad, d_out_pad),
                                       jnp.asarray(gcn_inputs).dtype),
        grid_spec=pltpu.PrefetchScalarGridSpec(
            num_scalar_prefetch=0,
            grid=grid,
            in_specs=in_specs,
            out_specs=out_spec,
        ),
        compiler_params=pltpu.CompilerParams(
            dimension_semantics=("parallel",),
            vmem_limit_bytes=vmem_limit,
        ),
        cost_estimate=cost,
    )(adj_p, x_p, inv_p, *const_inputs)

    return out_padded[:, :N, :D]


def reference(adj, x, weights, biases, w_out, b_out):
    """Pure-JAX reference of the PyTorch forward (eval mode)."""
    hp = jax.lax.Precision.HIGHEST
    denom = jnp.sum(adj, axis=2, keepdims=True) + 1.0
    outputs = x
    cache_list = [outputs]
    output_list = []
    for W, b in zip(weights, biases):
        Ax = jnp.einsum('bij,bjd->bid', adj, outputs, precision=hp)
        AxW = (jnp.einsum('bnd,dh->bnh', Ax, W, precision=hp) + b
               + jnp.einsum('bnd,dh->bnh', outputs, W, precision=hp) + b)
        AxW = AxW / denom
        g = jax.nn.relu(AxW)
        cache_list.append(g)
        outputs = jnp.concatenate(cache_list, axis=2)
        output_list.append(g)
    gcn_out = jnp.concatenate(output_list, axis=2) + x
    return jnp.einsum('bnd,de->bne', gcn_out, w_out, precision=hp) + b_out


if __name__ == "__main__":
    # Small shapes consistent with the module:
    #   batch=2, seq(N)=8, mem_dim=32, layers=2 -> head_dim=16
    B, N, mem_dim, layers = 2, 8, 32, 2
    head_dim = mem_dim // layers

    key = jax.random.PRNGKey(0)
    k_adj, k_x, *k_ws = jax.random.split(key, 2 + 2 * layers + 2)

    # Nonnegative 0/1 adjacency (typical dependency-graph adj).
    adj = (jax.random.uniform(k_adj, (B, N, N)) > 0.6).astype(jnp.float32)
    x = jax.random.normal(k_x, (B, N, mem_dim), dtype=jnp.float32)

    weights, biases = [], []
    for l in range(layers):
        in_dim = mem_dim + head_dim * l
        w = jax.random.normal(k_ws[2 * l], (in_dim, head_dim),
                              dtype=jnp.float32) * (1.0 / jnp.sqrt(in_dim))
        b = jax.random.normal(k_ws[2 * l + 1], (1, head_dim),
                              dtype=jnp.float32) * 0.01
        weights.append(w)
        biases.append(b)

    w_out = jax.random.normal(k_ws[2 * layers], (mem_dim, mem_dim),
                              dtype=jnp.float32) * (1.0 / jnp.sqrt(mem_dim))
    b_out = jax.random.normal(k_ws[2 * layers + 1], (1, mem_dim),
                              dtype=jnp.float32) * 0.01

    ref = reference(adj, x, weights, biases, w_out, b_out)

    # Exact-numerics path (f32 MXU operands): tight check.
    out_f32 = jax.block_until_ready(
        graph_conv_layer(adj, x, weights, biases, w_out, b_out,
                         mxu_dtype=jnp.float32))
    assert out_f32.shape == (B, N, mem_dim)
    assert jnp.allclose(out_f32, ref, atol=1e-3, rtol=1e-3), (
        "f32 mismatch vs reference: max abs diff "
        f"{float(jnp.max(jnp.abs(out_f32 - ref)))}")

    # Default fast path (bf16 MXU operands, f32 accumulation): looser check.
    out_bf16 = jax.block_until_ready(
        graph_conv_layer(adj, x, weights, biases, w_out, b_out))
    assert out_bf16.shape == (B, N, mem_dim)
    assert jnp.allclose(out_bf16, ref, atol=5e-2, rtol=5e-2), (
        "bf16 mismatch vs reference: max abs diff "
        f"{float(jnp.max(jnp.abs(out_bf16 - ref)))}")

    print("KERNEL_OK")
</pallas_src>

<mosaic_0001>
module attributes {stable_mosaic.version = 11 : i64} {
  func.func @kernel(%arg0: i32, %arg1: memref<1x8x8xf32, #tpu.memory_space<vmem>>, %arg2: memref<1x8x32xf32, #tpu.memory_space<vmem>>, %arg3: memref<1x8x1xf32, #tpu.memory_space<vmem>>, %arg4: memref<32x16xf32, #tpu.memory_space<vmem>>, %arg5: memref<32x16xf32, #tpu.memory_space<vmem>>, %arg6: memref<16x16xf32, #tpu.memory_space<vmem>>, %arg7: memref<1x16xf32, #tpu.memory_space<vmem>>, %arg8: memref<1x16xf32, #tpu.memory_space<vmem>>, %arg9: memref<32x128xf32, #tpu.memory_space<vmem>>, %arg10: memref<16x128xf32, #tpu.memory_space<vmem>>, %arg11: memref<16x128xf32, #tpu.memory_space<vmem>>, %arg12: memref<1x128xf32, #tpu.memory_space<vmem>>, %arg13: memref<1x8x128xf32, #tpu.memory_space<vmem>>) attributes {dimension_semantics = [#tpu.dimension_semantics<parallel>], iteration_bounds = array<i64: 2>, scalar_prefetch = 0 : i64, scratch_operands = 0 : i64, tpu.core_type = #tpu.core_type<tc>, window_params = [{transform_indices = @transform_0, window_bounds = array<i64: 1, 8, 8>}, {transform_indices = @transform_1, window_bounds = array<i64: 1, 8, 32>}, {transform_indices = @transform_2, window_bounds = array<i64: 1, 8, 1>}, {pipeline_mode = #tpu.pipeline_mode<synchronous>, transform_indices = @transform_3, window_bounds = array<i64: 32, 16>}, {pipeline_mode = #tpu.pipeline_mode<synchronous>, transform_indices = @transform_4, window_bounds = array<i64: 32, 16>}, {pipeline_mode = #tpu.pipeline_mode<synchronous>, transform_indices = @transform_5, window_bounds = array<i64: 16, 16>}, {pipeline_mode = #tpu.pipeline_mode<synchronous>, transform_indices = @transform_6, window_bounds = array<i64: 1, 16>}, {pipeline_mode = #tpu.pipeline_mode<synchronous>, transform_indices = @transform_7, window_bounds = array<i64: 1, 16>}, {pipeline_mode = #tpu.pipeline_mode<synchronous>, transform_indices = @transform_8, window_bounds = array<i64: 32, 128>}, {pipeline_mode = #tpu.pipeline_mode<synchronous>, transform_indices = @transform_9, window_bounds = array<i64: 16, 128>}, {pipeline_mode = #tpu.pipeline_mode<synchronous>, transform_indices = @transform_10, window_bounds = array<i64: 16, 128>}, {pipeline_mode = #tpu.pipeline_mode<synchronous>, transform_indices = @transform_11, window_bounds = array<i64: 1, 128>}, {transform_indices = @transform_12, window_bounds = array<i64: 1, 8, 128>}]} {
    %c0 = arith.constant 0 : index
    %c0_0 = arith.constant 0 : index
    %c0_1 = arith.constant 0 : index
    %0 = vector.load %arg1[%c0, %c0_0, %c0_1] : memref<1x8x8xf32, #tpu.memory_space<vmem>>, vector<1x8x8xf32>
    %c0_2 = arith.constant 0 : index
    %c0_3 = arith.constant 0 : index
    %c0_4 = arith.constant 0 : index
    %1 = vector.load %arg2[%c0_2, %c0_3, %c0_4] : memref<1x8x32xf32, #tpu.memory_space<vmem>>, vector<1x8x32xf32>
    %c0_5 = arith.constant 0 : index
    %c0_6 = arith.constant 0 : index
    %c0_7 = arith.constant 0 : index
    %2 = vector.load %arg3[%c0_5, %c0_6, %c0_7] : memref<1x8x1xf32, #tpu.memory_space<vmem>>, vector<1x8x1xf32>
    %3 = vector.shape_cast %2 : vector<1x8x1xf32> to vector<8x1xf32>
    %4 = vector.shape_cast %3 : vector<8x1xf32> to vector<8x1xf32>
    %5 = vector.broadcast %4 : vector<8x1xf32> to vector<8x16xf32>
    "tpu.trace_start"() <{level = 10 : i32, message = "bij,bjk->bik"}> : () -> ()
    %cst = arith.constant dense<0.000000e+00> : vector<1x8x32xf32>
    %6 = tpu.matmul %0, %1, %cst {dimension_numbers = #tpu.dot_dimension_numbers<[2], [1], [1], [2], [0, 0, 0, 1, 1, 2], [0], [0]>} : vector<1x8x8xf32>, vector<1x8x32xf32>, vector<1x8x32xf32> -> vector<1x8x32xf32>
    "tpu.trace_stop"() : () -> ()
    %7 = arith.addf %6, %1 : vector<1x8x32xf32>
    %8 = vector.shape_cast %7 : vector<1x8x32xf32> to vector<8x32xf32>
    %c0_8 = arith.constant 0 : index
    %c0_9 = arith.constant 0 : index
    %9 = vector.load %arg4[%c0_8, %c0_9] : memref<32x16xf32, #tpu.memory_space<vmem>>, vector<32x16xf32>
    %cst_10 = arith.constant dense<0.000000e+00> : vector<8x16xf32>
    %10 = tpu.matmul %8, %9, %cst_10 {dimension_numbers = #tpu.dot_dimension_numbers<[1], [0], [0], [1], [0, 0, 1, 1], [], []>} : vector<8x32xf32>, vector<32x16xf32>, vector<8x16xf32> -> vector<8x16xf32>
    %c0_11 = arith.constant 0 : index
    %c0_12 = arith.constant 0 : index
    %11 = vector.load %arg7[%c0_11, %c0_12] : memref<1x16xf32, #tpu.memory_space<vmem>>, vector<1x16xf32>
    %12 = vector.broadcast %11 : vector<1x16xf32> to vector<8x16xf32>
    %13 = arith.addf %10, %12 : vector<8x16xf32>
    %14 = arith.mulf %13, %5 : vector<8x16xf32>
    %cst_13 = arith.constant 0.000000e+00 : f32
    %15 = vector.broadcast %cst_13 : f32 to vector<8x16xf32>
    %16 = arith.maximumf %14, %15 : vector<8x16xf32>
    %17 = vector.shape_cast %16 : vector<8x16xf32> to vector<1x8x16xf32>
    "tpu.trace_start"() <{level = 10 : i32, message = "bij,bjk->bik"}> : () -> ()
    %cst_14 = arith.constant dense<0.000000e+00> : vector<1x8x16xf32>
    %18 = tpu.matmul %0, %17, %cst_14 {dimension_numbers = #tpu.dot_dimension_numbers<[2], [1], [1], [2], [0, 0, 0, 1, 1, 2], [0], [0]>} : vector<1x8x8xf32>, vector<1x8x16xf32>, vector<1x8x16xf32> -> vector<1x8x16xf32>
    "tpu.trace_stop"() : () -> ()
    %19 = vector.shape_cast %18 : vector<1x8x16xf32> to vector<8x16xf32>
    %20 = arith.addf %19, %16 : vector<8x16xf32>
    %c0_15 = arith.constant 0 : index
    %c0_16 = arith.constant 0 : index
    %21 = vector.load %arg5[%c0_15, %c0_16] : memref<32x16xf32, #tpu.memory_space<vmem>>, vector<32x16xf32>
    %cst_17 = arith.constant dense<0.000000e+00> : vector<8x16xf32>
    %22 = tpu.matmul %8, %21, %cst_17 {dimension_numbers = #tpu.dot_dimension_numbers<[1], [0], [0], [1], [0, 0, 1, 1], [], []>} : vector<8x32xf32>, vector<32x16xf32>, vector<8x16xf32> -> vector<8x16xf32>
    %c0_18 = arith.constant 0 : index
    %c0_19 = arith.constant 0 : index
    %23 = vector.load %arg8[%c0_18, %c0_19] : memref<1x16xf32, #tpu.memory_space<vmem>>, vector<1x16xf32>
    %24 = vector.broadcast %23 : vector<1x16xf32> to vector<8x16xf32>
    %25 = arith.addf %22, %24 : vector<8x16xf32>
    %c0_20 = arith.constant 0 : index
    %c0_21 = arith.constant 0 : index
    %26 = vector.load %arg6[%c0_20, %c0_21] : memref<16x16xf32, #tpu.memory_space<vmem>>, vector<16x16xf32>
    %cst_22 = arith.constant dense<0.000000e+00> : vector<8x16xf32>
    %27 = tpu.matmul %20, %26, %cst_22 {dimension_numbers = #tpu.dot_dimension_numbers<[1], [0], [0], [1], [0, 0, 1, 1], [], []>} : vector<8x16xf32>, vector<16x16xf32>, vector<8x16xf32> -> vector<8x16xf32>
    %28 = arith.addf %25, %27 : vector<8x16xf32>
    %29 = arith.mulf %28, %5 : vector<8x16xf32>
    %cst_23 = arith.constant 0.000000e+00 : f32
    %30 = vector.broadcast %cst_23 : f32 to vector<8x16xf32>
    %31 = arith.maximumf %29, %30 : vector<8x16xf32>
    %32 = vector.shape_cast %1 : vector<1x8x32xf32> to vector<8x32xf32>
    %c0_24 = arith.constant 0 : index
    %c0_25 = arith.constant 0 : index
    %33 = vector.load %arg9[%c0_24, %c0_25] : memref<32x128xf32, #tpu.memory_space<vmem>>, vector<32x128xf32>
    %cst_26 = arith.constant dense<0.000000e+00> : vector<8x128xf32>
    %34 = tpu.matmul %32, %33, %cst_26 {dimension_numbers = #tpu.dot_dimension_numbers<[1], [0], [0], [1], [0, 0, 1, 1], [], []>} : vector<8x32xf32>, vector<32x128xf32>, vector<8x128xf32> -> vector<8x128xf32>
    %c0_27 = arith.constant 0 : index
    %c0_28 = arith.constant 0 : index
    %35 = vector.load %arg12[%c0_27, %c0_28] : memref<1x128xf32, #tpu.memory_space<vmem>>, vector<1x128xf32>
    %36 = vector.broadcast %35 : vector<1x128xf32> to vector<8x128xf32>
    %37 = arith.addf %34, %36 : vector<8x128xf32>
    %c0_29 = arith.constant 0 : index
    %c0_30 = arith.constant 0 : index
    %38 = vector.load %arg10[%c0_29, %c0_30] : memref<16x128xf32, #tpu.memory_space<vmem>>, vector<16x128xf32>
    %cst_31 = arith.constant dense<0.000000e+00> : vector<8x128xf32>
    %39 = tpu.matmul %16, %38, %cst_31 {dimension_numbers = #tpu.dot_dimension_numbers<[1], [0], [0], [1], [0, 0, 1, 1], [], []>} : vector<8x16xf32>, vector<16x128xf32>, vector<8x128xf32> -> vector<8x128xf32>
    %40 = arith.addf %37, %39 : vector<8x128xf32>
    %c0_32 = arith.constant 0 : index
    %c0_33 = arith.constant 0 : index
    %41 = vector.load %arg11[%c0_32, %c0_33] : memref<16x128xf32, #tpu.memory_space<vmem>>, vector<16x128xf32>
    %cst_34 = arith.constant dense<0.000000e+00> : vector<8x128xf32>
    %42 = tpu.matmul %31, %41, %cst_34 {dimension_numbers = #tpu.dot_dimension_numbers<[1], [0], [0], [1], [0, 0, 1, 1], [], []>} : vector<8x16xf32>, vector<16x128xf32>, vector<8x128xf32> -> vector<8x128xf32>
    %43 = arith.addf %40, %42 : vector<8x128xf32>
    %44 = vector.shape_cast %43 : vector<8x128xf32> to vector<1x8x128xf32>
    %c0_35 = arith.constant 0 : index
    %c0_36 = arith.constant 0 : index
    %c0_37 = arith.constant 0 : index
    %45 = vector.load %arg13[%c0_35, %c0_36, %c0_37] : memref<1x8x128xf32, #tpu.memory_space<vmem>>, vector<1x8x128xf32>
    tpu.vector_store %arg13[%c0_35, %c0_36, %c0_37], %44 {strides = array<i32>} : memref<1x8x128xf32, #tpu.memory_space<vmem>>, vector<1x8x128xf32>,
    return
  }
  func.func @transform_0(%arg0: i32) -> (i32, i32, i32) {
    %c0_i32 = arith.constant 0 : i32
    %c0_i32_0 = arith.constant 0 : i32
    %c0_i32_1 = arith.constant 0 : i32
    return %arg0, %c0_i32, %c0_i32_0 : i32, i32, i32
  }
  func.func @transform_1(%arg0: i32) -> (i32, i32, i32) {
    %c0_i32 = arith.constant 0 : i32
    %c0_i32_0 = arith.constant 0 : i32
    %c0_i32_1 = arith.constant 0 : i32
    return %arg0, %c0_i32, %c0_i32_0 : i32, i32, i32
  }
  func.func @transform_2(%arg0: i32) -> (i32, i32, i32) {
    %c0_i32 = arith.constant 0 : i32
    %c0_i32_0 = arith.constant 0 : i32
    %c0_i32_1 = arith.constant 0 : i32
    return %arg0, %c0_i32, %c0_i32_0 : i32, i32, i32
  }
  func.func @transform_3(%arg0: i32) -> (i32, i32) {
    %c0_i32 = arith.constant 0 : i32
    %c0_i32_0 = arith.constant 0 : i32
    %c0_i32_1 = arith.constant 0 : i32
    return %c0_i32, %c0_i32_0 : i32, i32
  }
  func.func @transform_4(%arg0: i32) -> (i32, i32) {
    %c0_i32 = arith.constant 0 : i32
    %c0_i32_0 = arith.constant 0 : i32
    %c0_i32_1 = arith.constant 0 : i32
    return %c0_i32, %c0_i32_0 : i32, i32
  }
  func.func @transform_5(%arg0: i32) -> (i32, i32) {
    %c0_i32 = arith.constant 0 : i32
    %c0_i32_0 = arith.constant 0 : i32
    %c0_i32_1 = arith.constant 0 : i32
    return %c0_i32, %c0_i32_0 : i32, i32
  }
  func.func @transform_6(%arg0: i32) -> (i32, i32) {
    %c0_i32 = arith.constant 0 : i32
    %c0_i32_0 = arith.constant 0 : i32
    %c0_i32_1 = arith.constant 0 : i32
    return %c0_i32, %c0_i32_0 : i32, i32
  }
  func.func @transform_7(%arg0: i32) -> (i32, i32) {
    %c0_i32 = arith.constant 0 : i32
    %c0_i32_0 = arith.constant 0 : i32
    %c0_i32_1 = arith.constant 0 : i32
    return %c0_i32, %c0_i32_0 : i32, i32
  }
  func.func @transform_8(%arg0: i32) -> (i32, i32) {
    %c0_i32 = arith.constant 0 : i32
    %c0_i32_0 = arith.constant 0 : i32
    %c0_i32_1 = arith.constant 0 : i32
    return %c0_i32, %c0_i32_0 : i32, i32
  }
  func.func @transform_9(%arg0: i32) -> (i32, i32) {
    %c0_i32 = arith.constant 0 : i32
    %c0_i32_0 = arith.constant 0 : i32
    %c0_i32_1 = arith.constant 0 : i32
    return %c0_i32, %c0_i32_0 : i32, i32
  }
  func.func @transform_10(%arg0: i32) -> (i32, i32) {
    %c0_i32 = arith.constant 0 : i32
    %c0_i32_0 = arith.constant 0 : i32
    %c0_i32_1 = arith.constant 0 : i32
    return %c0_i32, %c0_i32_0 : i32, i32
  }
  func.func @transform_11(%arg0: i32) -> (i32, i32) {
    %c0_i32 = arith.constant 0 : i32
    %c0_i32_0 = arith.constant 0 : i32
    %c0_i32_1 = arith.constant 0 : i32
    return %c0_i32, %c0_i32_0 : i32, i32
  }
  func.func @transform_12(%arg0: i32) -> (i32, i32, i32) {
    %c0_i32 = arith.constant 0 : i32
    %c0_i32_0 = arith.constant 0 : i32
    %c0_i32_1 = arith.constant 0 : i32
    return %arg0, %c0_i32, %c0_i32_0 : i32, i32, i32
  }
}

</mosaic_0001>

<bundles_post_ra>
// kernel: tpu_custom_call.1
= control target key start
LH: loop header
LB: loop body
LE: loop exit
PB: predicated region body
PF: predicated region fallthrough
CT: control target
= control target key end

     0   :  { %17 = vsyncpa [#allocation3], 0  ;;  %s1293_s0 = inlined_call_operand.vmem [shape: f32[2,8,8], index: 0, kind: input, shape index: {}]   ;;  %s1294_s1 = inlined_call_operand.vmem [shape: f32[2,8,32], index: 1, kind: input, shape index: {}]   ;;  %s1295_s2 = inlined_call_operand.vmem [shape: f32[2,8,1], index: 2, kind: input, shape index: {}]   ;;  %s1296_s3 = inlined_call_operand.vmem [shape: f32[32,16], index: 3, kind: input, shape index: {}]   ;;  %s1297_s4 = inlined_call_operand.vmem [shape: f32[32,16], index: 4, kind: input, shape index: {}]   ;;  %s1298_s5 = inlined_call_operand.vmem [shape: f32[16,16], index: 5, kind: input, shape index: {}]   ;;  %s1299_s6 = inlined_call_operand.vmem [shape: f32[1,16], index: 6, kind: input, shape index: {}]   ;;  %s1300_s7 = inlined_call_operand.vmem [shape: f32[1,16], index: 7, kind: input, shape index: {}]   ;;  %s1301_s8 = inlined_call_operand.vmem [shape: f32[32,128], index: 8, kind: input, shape index: {}]   ;;  %s1302_s9 = inlined_call_operand.hbm [shape: f32[16,128], index: 9, kind: input, shape index: {}]   ;;  %s1303_s10 = inlined_call_operand.hbm [shape: f32[16,128], index: 10, kind: input, shape index: {}]   ;;  %s1304_s11 = inlined_call_operand.vmem [shape: f32[1,128], index: 11, kind: input, shape index: {}]   ;;  %s1305_s12 = inlined_call_operand.hbm [shape: f32[2,8,128], index: 12, kind: output, shape index: {}]  }
   0x1   :  { %18 = vsyncpa [#allocation6], 0 }
   0x2   :  { %19 = vsyncpa [#allocation4], 0 }
   0x3   :  { %21 = vsyncpa [#allocation4 + $0x1], 0  ;;  %s1118_s21 = smov 0   ;;  %s1120_s22 = smov 0  }
   0x4   :  { %s1122_s23 = smov 0   ;;  %s1124_s24 = smov 0  }
   0x5 LB: > { %1309 = sst [smem:[#allocation11_spill]] %s1042_s23  ;;  %s1139_s25 = sadd.s32 4294967295, %s1046_s24   ;;  %s1046_s24 = sphi %s1124_s24, %s1315_s24   ;;  %s1042_s23 = sphi %s1122_s23, %s1320_s23   ;;  %s1038_s22 = sphi %s1120_s22, %s1319_s22   ;;  %s1034_s21 = sphi %s1118_s21, %s1318_s21  }
   0x6   : > { %s825_s26 = sadd.s32 4294967294, %s1046_s24   ;;  %s1143_s27 = sadd.s32 1, %s1046_s24  }
   0x7   : > { %1310 = sst [smem:[#allocation12_spill]] %s1143_s27  ;;  %s301_s28 = sadd.s32 1, %s1042_s23 }
   0x8   : > { %s298_s29 = ssub.s32 %s1046_s24, %s1143_s27  ;;  %p311_p0 = scmp.ne.s32.totalorder %s1042_s23, %s1038_s22 }
   0x9   : > { %p299_p1 = scmp.eq.s32.totalorder %s298_s29, 0  ;;  %p312_p2 = scmp.eq.s32.totalorder %s1139_s25, 1 }
   0xa   : > { %p317_p3 = scmp.ne.s32.totalorder %s1038_s22, %s1034_s21  ;;  %p318_p4 = scmp.eq.s32.totalorder %s825_s26, 1 }
   0xb   : > { %s1154_s30 = scalar_select %p299_p1, %s1042_s23, %s301_s28  }
   0xc   : > { %p1156_p5 = por %p312_p2, %p311_p0  ;;  %p1160_p6 = por %p318_p4, %p317_p3 }
   0xd   : > { %1311 = sst [smem:[#allocation13_spill]] %s1154_s30  ;;  %p826_p7 = scmp.ge.s32.totalorder %s1046_s24, 1 }
   0xe   : > { %p325_p8 = scmp.lt.s32.totalorder %s1046_s24, 3  ;;  %p870_p9 = scmp.eq.s32.totalorder %s1139_s25, 0 }
   0xf   : > { %s354_s18 = sshll.u32 %s1302_s9, 4  ;;  %s1048_s19 = smov [#allocation2]   ;;  %s355_s18 = int_to_ptr.hbm [resolvable:$true] %s354_s18 }
  0x10   : > { %p1167_p10 = pnand %p826_p7, %p325_p8  ;;  %s356_s20 = sshll.u32 %s1048_s19, 4  ;;  %s357_s20 = int_to_ptr.vmem [resolvable:$true] %s356_s20 }
  0x11   : > { %s368_s29 = sshll.u32 %s1303_s10, 4  ;;  %s1049_s30 = smov 128   ;;  %s369_s29 = int_to_ptr.hbm [resolvable:$true] %s368_s29 }
  0x12   : > { %p859_p11 = pneg %p1167_p10  ;;  %s1050_s23 = smov 8  }
  0x13   : > { %s1051_s27 = smov [#allocation5]   ;;  %410 = sbr.rel (%p1167_p10) target bundleno = 699 (0x2bb), region = 68 }
  0x14   : > { %p860_p12 = pnand %p870_p9, %p859_p11  ;;  %s370_s16 = sshll.u32 %s1051_s27, 4  ;;  %s371_s16 = int_to_ptr.vmem [resolvable:$true] %s370_s16 }
  0x16   : > { %862 = dma.hbm_to_vmem [thread:$0]  (!%p860_p12), %s355_s18, 256, %s357_s20, [#allocation3], %s1049_s30, %s1049_s30, %s1050_s23  }
  0x17   : > { %865 = dma.hbm_to_vmem [thread:$0]  (!%p860_p12), %s369_s29, 256, %s371_s16, [#allocation6], %s1049_s30, %s1049_s30, %s1050_s23  }
  0x18   : > { %1021 = dma.done.wait (%p870_p9), [#allocation3], 256  }
  0x19   : > { %1023 = vsyncadd (%p870_p9), [#allocation3], 4294967040 }
  0x1a   : > { %1025 = dma.done.wait (%p870_p9), [#allocation6], 256  }
  0x1b   : > { %1027 = vsyncadd (%p870_p9), [#allocation6], 4294967040  ;;  %p465_p13 = scmp.lt.s32.totalorder %s1139_s25, 1  ;;  %vm485_vm0 = vcmask 64512   ;;  %v512_v2 = vld [vmem:[%s1296_s3 + $0x18] sm:$0xff]  ;;  %v511_v4 = vld [vmem:[%s1296_s3 + $0x10] sm:$0xff] }
  0x1c   : > { %533 = vmatpush.msra.mxu1 %v512_v2  ;;  %v566_v3 = vld [vmem:[%s1297_s4 + $0x18] sm:$0xff]  ;;  %v565_v5 = vld [vmem:[%s1297_s4 + $0x10] sm:$0xff]  ;;  %v510_v6 = vld [vmem:[%s1296_s3 + $0x8] sm:$0xff]  ;;  %v1052_v11 = vmov 0   ;;  %vm517_vm1 = vcmask 261120   ;;  %vm593_vm2 = vcmask 130048  }
  0x1d   : > { %s466_s27 = scalar_select %p465_p13, %s1139_s25, 1  ;;  %583 = vmatpush.msra.mxu3 %v566_v3  ;;  %v564_v7 = vld [vmem:[%s1297_s4 + $0x8] sm:$0xff]  ;;  %v509_v8 = vld [vmem:[%s1296_s3] sm:$0xff]  ;;  %912 = vset.pattern.permute.xlu0 %v1052_v11  ;;  %v623_v22 = vld [vmem:[%s1301_s8 + $0x18] sm:$0xff] }
  0x1e   : > { %534 = vmatpush.msra.mxu1 %v511_v4  ;;  %v563_v9 = vld [vmem:[%s1297_s4] sm:$0xff]  ;;  %v652_v14 = vld [vmem:[#allocation2 + $0x8] sm:$0xff]  ;;  %v622_v23 = vld [vmem:[%s1301_s8 + $0x10] sm:$0xff]  ;;  %s462_s26 = sand.u32 1, %s1038_s22  }
  0x1f   : > { %s834_s23 = sshll.u32 %s466_s27, 3  ;;  %584 = vmatpush.msra.mxu3 %v565_v5  ;;  %v651_v15 = vld [vmem:[#allocation2] sm:$0xff]  ;;  %v621_v24 = vld [vmem:[%s1301_s8 + $0x8] sm:$0xff]  ;;  %v678_v28 = vld [vmem:[#allocation5 + $0x8] sm:$0xff]  ;;  %s846_s27 = sshll.u32 %s1139_s25, 3 }
  0x20   : > { %s472_s17 = scalar_lea.vmem %s1294_s1, %s834_s23  ;;  %s468_s20 = scalar_lea.vmem %s1293_s0, %s834_s23  ;;  %535 = vmatpush.msra.mxu1 %v510_v6  ;;  %v913_v16 = vld [vmem:[%s1299_s6] ss:$0 sm:$0xff]  ;;  %v592_v26 = vld [vmem:[%s1298_s5 + $0x8] sm:$0xff]  ;;  %v677_v31 = vld [vmem:[#allocation5] sm:$0xff] }
  0x21   : > { %v478_v0 = vld [vmem:[%s472_s17] sm:$0xff]  ;;  %585 = vmatpush.msra.mxu3 %v564_v7  ;;  %s476_s16 = scalar_lea.vmem %s1295_s2, %s834_s23  ;;  %s715_s18 = scalar_lea.hbm %s1305_s12, %s846_s27 }
  0x22   : > { %v477_v1 = vld [vmem:[%s468_s20] sm:$0xff]  ;;  %504 = vmatpush.msra.mxu0 %v478_v0  ;;  %536 = vmatpush.msra.mxu1 %v509_v8  ;;  %s719_s19 = sshll.u32 %s715_s18, 4  ;;  %s705_s20 = scalar_lea.sflag [#allocation4], %s462_s26  ;;  %s720_s19 = int_to_ptr.hbm [resolvable:$true] %s719_s19 }
  0x23   : > { %837 = vmatmul.msk.f32.vlgmr.msra.gmra.mxu0 %vm485_vm0, %v477_v1  ;;  %586 = vmatpush.msra.mxu3 %v563_v9  ;;  %v479_v10 = vld [vmem:[%s476_s16] sm:$0xff]  ;;  %s833_s16 = sshll.u32 %s462_s26, 3  ;;  %s990_s28 = sshra.s32 %s720_s19, 4  ;;  %s991_s28 = int_to_ptr.hbm [resolvable:$true] %s990_s28 }
  0x24   : > { %482 = vperm.xlu0 %912, %v479_v10   ;;  %670 = vmatpush.msrb.mxu1 %v652_v14  ;;  %v620_v25 = vld [vmem:[%s1301_s8] sm:$0xff]  ;;  %s464_s23 = scalar_lea.vmem [#allocation7], %s833_s16  ;;  %s992_s25 = scalar_lea.hbm %s991_s28, 8 }
  0x25   : > { %v591_v27 = vld [vmem:[%s1298_s5] sm:$0xff]  ;;  %611 = vmatpush.msrb.mxu0 %v592_v26  ;;  %696 = vmatpush.msrb.mxu3 %v678_v28  ;;  %s717_s17 = sshll.u32 %s464_s23, 4  ;;  %p993_p0 = scmp.ne.s32.totalorder %s991_s28, %s992_s25  ;;  %s718_s17 = int_to_ptr.vmem [resolvable:$true] %s717_s17 }
  0x26   : > { %671 = vmatpush.msrb.mxu1 %v651_v15  ;;  %v914_v32 = vld [vmem:[%s1300_s7] ss:$0 sm:$0xff]  ;;  %s996_s16 = scalar_lea.hbm %s1305_s12, 16  ;;  %p997_p3 = scmp.lt.s32.totalorder %s991_s28, %s1305_s12 }
  0x27   : > { %612 = vmatpush.msrb.mxu0 %v591_v27  ;;  %697 = vmatpush.msrb.mxu3 %v677_v31  ;;  %v915_v39 = vld [vmem:[%s1304_s11] ss:$0 sm:$0xff]  ;;  %p994_p1 = pnand %p993_p0, %p1156_p5  ;;  %p998_p4 = scmp.lt.s32.totalorder %s996_s16, %s992_s25 }
  0x29   : > { %p995_p2 = pneg %p994_p1  ;;  %p999_p7 = por %p998_p4, %p997_p3 }
  0x2b   : > { %p1000_p8 = pnand %p999_p7, %p995_p2 }
  0x96   : > { %v483_v18 = vpop.permute.xlu0 %482 }
  0xa0   : > { %v506_v12 = vpop.f32.mrf.mxu0 }
  0xa1   : > { %v507_v13 = vadd.f32 %v506_v12, %v478_v0 }
  0xa3   : > { %838 = vmatmul.msk.f32.vlgmr.msra.gmra.mxu1 %vm517_vm1, %v507_v13  ;;  %840 = vmatmul.msk.f32.vlgmr.msra.gmra.mxu3 %vm517_vm1, %v507_v13 }
 0x120   : > { %v538_v17 = vpop.f32.mrf.mxu1 }
 0x121   : > { %v539_v19 = vadd.f32 %v913_v16, %v538_v17 }
 0x123   : > { %v541_v20 = vmul.f32 %v539_v19, %v483_v18 }
 0x125   : > { %v542_v21 = vmax.f32 %v541_v20, 0.0 }
 0x126   : > { %v588_v33 = vpop.f32.mrf.mxu3 }
 0x127   : > { %558 = vmatpush.msra.mxu2 %v542_v21  ;;  %843 = vmatmul.msk.f32.vlgmr.msrb.gmra.mxu1 %vm593_vm2, %v542_v21  ;;  %v589_v34 = vadd.f32 %v914_v32, %v588_v33 }
 0x128   : > { %839 = vmatmul.msk.f32.vlgmr.msra.gmra.mxu2 %vm485_vm0, %v477_v1 }
 0x129   : > { %643 = vmatpush.msrb.mxu2 %v623_v22 }
 0x12b   : > { %644 = vmatpush.msrb.mxu2 %v622_v23 }
 0x12d   : > { %645 = vmatpush.msrb.mxu2 %v621_v24 }
 0x12f   : > { %646 = vmatpush.msrb.mxu2 %v620_v25 }
 0x130   : > { %842 = vmatmul.msk.f32.vlgmr.msrb.gmra.mxu2 %vm517_vm1, %v478_v0 }
 0x1a4   : > { %v673_v42 = vpop.f32.mrf.mxu1 }
 0x1ab   : > { %v560_v29 = vpop.f32.mrf.mxu2 }
 0x1ac   : > { %v561_v30 = vadd.f32 %v560_v29, %v542_v21 }
 0x1ae   : > { %841 = vmatmul.msk.f32.vlgmr.msrb.gmra.mxu0 %vm593_vm2, %v561_v30 }
 0x1b3   : > { %v648_v40 = vpop.f32.mrf.mxu2 }
 0x1b4   : > { %v649_v41 = vadd.f32 %v915_v39, %v648_v40 }
 0x1b6   : > { %v676_v43 = vadd.f32 %v673_v42, %v649_v41 }
 0x22b   : > { %v614_v35 = vpop.f32.mrf.mxu0 }
 0x22c   : > { %v617_v36 = vadd.f32 %v614_v35, %v589_v34 }
 0x22e   : > { %v618_v37 = vmul.f32 %v617_v36, %v483_v18 }
 0x230   : > { %v619_v38 = vmax.f32 %v618_v37, 0.0 }
 0x232   : > { %844 = vmatmul.msk.f32.vlgmr.msrb.gmra.mxu3 %vm593_vm2, %v619_v38 }
 0x2b5   : > { %v699_v44 = vpop.f32.mrf.mxu3 }
 0x2b6   : > { %v702_v45 = vadd.f32 %v699_v44, %v676_v43 }
 0x2b8   : > { %703 = vst [vmem:[%s464_s23] sm:$0xff] %v702_v45 }
 0x2b9   : > { %1003 = shalt.err (!%p1000_p8)
}
 0x2ba   : > { %857 = dma.vmem_to_hbm [thread:$0]  (%p1156_p5), %s718_s17, 128, %s720_s19, %s705_s20  }
 0x2bb PF: > { %p874_p9 = scmp.ge.s32.totalorder %s1046_s24, 2  ;;  %s731_s26 = sand.u32 1, %s1034_s21  }
 0x2bc   : > { %s732_s18 = scalar_lea.sflag [#allocation4], %s731_s26 }
 0x2bd   : > { %p867_p10 = pnand %p874_p9, %p1160_p6 }
 0x2bf   : > { %p868_p11 = pneg %p867_p10 }
 0x2c1   : > { %1029 = dma.done.wait (%p868_p11), %s732_s18, 128  }
 0x2c2   : > { %1031 = vsyncadd (%p868_p11), %s732_s18, 4294967168  ;;  %s1315_s24 = sld [smem:[#allocation12_spill]]  ;;  %s1318_s21 = smov %s1038_s22 }
 0x2c3   : > { %s1316_s23 = sld [smem:[#allocation11_spill]] }
 0x2c4   : > { %s1317_s28 = sld [smem:[#allocation13_spill]] }
 0x2c8   : > { %p24_p12 = scmp.ge.s32.totalorder %s1315_s24, 4  }
 0x2c9   : > { %s1319_s22 = smov %s1316_s23 }
 0x2ca   : > { %s1320_s23 = smov %s1317_s28  ;;  %26 = sbr.rel (!%p24_p12) target bundleno = 5 (0x5), region = 118 }
 0x2cf   :  { %738 = vsyncpa [#allocation3], 1 }
 0x2d0   :  { %740 = vsyncpa [#allocation3 + $0x1], 1 }
 0x2d1   :  { %741 = vsyncpa [#allocation6], 1 }
 0x2d2   :  { %742 = vsyncpa [#allocation4], 1 }
 0x2d3   :  { %744 = vsyncpa [#allocation4 + $0x1], 1 }

</bundles_post_ra>
